<compile_context>
chip_gen: v5e
topology: v5e:2x2
jax: 0.10.0
libtpu: 0.0.40
codegen_flags: <defaults>
</compile_context>

<pallas_src>
import functools

import jax
import jax.numpy as jnp
from jax import lax
from jax.experimental import pallas as pl
from jax.experimental.pallas import tpu as pltpu

EPS = 0.2


def _pow2_mult_128(x):
    """Smallest power-of-two multiple of 128 that is >= max(x, 128)."""
    t = 128
    while t < x:
        t *= 2
    return t


def _default_vmem_limit_bytes():
    cap = None
    try:
        info = pltpu.get_tpu_info()
        cap = getattr(info, "vmem_capacity_bytes", None)
    except Exception:
        cap = None
    if not cap:
        cap = 64 * 1024 * 1024            # conservative (v7x per-TC VMEM)
    return int(min(64 * 1024 * 1024, (cap * 5) // 8))


def _default_n_cores():
    try:
        kind = jax.devices()[0].device_kind.lower()
    except Exception:
        return 1
    # v7x exposes 2 TensorCores per chip; on single-TC v5e/v6e an extra grid
    # axis only shrinks tiles and adds per-step overhead.
    return 2 if "v7" in kind else 1


def _fold_lanes(x, out_lanes=128):
    """Sum lane-blocks of x (shape (c, t), t = out_lanes * 2^k) down to
    (c, out_lanes) using only lane-aligned static slices + VPU adds."""
    t = x.shape[-1]
    while t > out_lanes:
        t //= 2
        x = x[:, :t] + x[:, t:2 * t]
    return x


def _loss_kernel(pred_ref, tgt_ref, won_ref, woff_ref, out_ref, acc_ref, *,
                 n_valid, inv_n, tile_n, tiles_per_core, last_tile, ragged,
                 overcover):
    k = pl.program_id(1)

    @pl.when(k == 0)
    def _():
        acc_ref[...] = jnp.zeros_like(acc_ref)

    pred = pred_ref[...].astype(jnp.float32)          # (C, T) classes x points
    tgt = tgt_ref[...]                                # (1, T) int32
    w_on = won_ref[...]                               # (C, 1) f32: weight*(1-eps)
    w_off = woff_ref[...]                             # (C, 1) f32: weight*eps/(C-1)
    c, t = pred.shape

    # Fused one-hot + label smoothing + class weight: a single select.
    cls_idx = lax.broadcasted_iota(jnp.int32, (c, 1), 0)     # one vreg
    sel_w = jnp.where(cls_idx == tgt, w_on, w_off)           # (C, T)

    # log_softmax over the class axis (axis 0 == sublanes).
    m = jnp.max(pred, axis=0, keepdims=True)
    shifted = pred - m
    lse = jnp.log(jnp.sum(jnp.exp(shifted), axis=0, keepdims=True))
    prod = sel_w * (shifted - lse)                           # (C, T)

    tile_idx = pl.program_id(0) * tiles_per_core + k

    # Interior (fully valid) tiles: plain vreg accumulation, no mask.
    if ragged:
        full_pred = tile_idx < last_tile
    elif overcover:
        full_pred = tile_idx <= last_tile
    else:
        full_pred = None

    if full_pred is None:
        acc_ref[...] += _fold_lanes(prod)
    else:
        @pl.when(full_pred)
        def _():
            acc_ref[...] += _fold_lanes(prod)

    # Ragged last tile only: mask out-of-range columns.  The input is unpadded,
    # so the OOB part of the block holds unspecified data; the select (and the
    # column-independent log_softmax) keeps it from leaking into the sum.
    if ragged:
        @pl.when(tile_idx == last_tile)
        def _():
            col = lax.broadcasted_iota(jnp.int32, (1, t), 1) + tile_idx * tile_n
            masked = jnp.where(col < n_valid, prod, 0.0)
            acc_ref[...] += _fold_lanes(masked)

    @pl.when(k == pl.num_programs(1) - 1)
    def _():
        # Single cross-lane reduce + compile-time -1/N scale, once per core.
        out_ref[...] = (jnp.sum(acc_ref[...]) * (-inv_n)).reshape(1, 1, 1)


def get_loss_pallas(pred, target, weight, *, tile_n_max=65536, n_cores=None,
                    vmem_limit_bytes=None):
    """pred: (N, C) logits (f32 or bf16), target: (N,) int, weight: (C,) -> f32 loss."""
    n, c = pred.shape
    assert c > 1, "label smoothing requires at least 2 classes"

    if n_cores is None:
        n_cores = _default_n_cores()
    if vmem_limit_bytes is None:
        vmem_limit_bytes = _default_vmem_limit_bytes()

    # Lane-dense transposed layout: classes on sublanes, points on lanes.
    # TODO(synk): emit the logits directly in (C, N) layout upstream (fold this
    # transpose into the classifier matmul) to drop this extra HBM pass.
    pred_t = jnp.swapaxes(pred, 0, 1)                     # (C, N), native dtype
    target2d = target.astype(jnp.int32).reshape(1, n)     # (1, N)

    w = weight.astype(jnp.float32).reshape(c, 1)
    w_on = w * (1.0 - EPS)
    w_off = w * (EPS / (c - 1))

    # Tile size: power-of-two multiple of 128 (required by the lane-fold tree).
    tile_n_max = _pow2_mult_128(tile_n_max)
    per_core = -(-n // n_cores)
    tile_n = min(tile_n_max, _pow2_mult_128(per_core))
    tiles_per_core = -(-per_core // tile_n)

    total_tiles = -(-n // tile_n)          # blocks actually present (no padding)
    last_tile = (n - 1) // tile_n
    ragged = (n % tile_n) != 0
    overcover = n_cores * tiles_per_core > total_tiles

    def tile_map(p, k):
        # Clamp so over-covering grid steps (possible when n_cores inflates the
        # grid) never issue an out-of-range block index; they are skipped in-kernel.
        return (0, jnp.minimum(p * tiles_per_core + k, last_tile))

    kernel = functools.partial(
        _loss_kernel,
        n_valid=n,
        inv_n=1.0 / n,
        tile_n=tile_n,
        tiles_per_core=tiles_per_core,
        last_tile=last_tile,
        ragged=ragged,
        overcover=overcover,
    )

    partials = pl.pallas_call(
        kernel,
        out_shape=jax.ShapeDtypeStruct((n_cores, 1, 1), jnp.float32),
        grid=(n_cores, tiles_per_core),
        in_specs=[
            pl.BlockSpec((c, tile_n), tile_map),
            pl.BlockSpec((1, tile_n), tile_map),
            pl.BlockSpec((c, 1), lambda p, k: (0, 0)),
            pl.BlockSpec((c, 1), lambda p, k: (0, 0)),
        ],
        out_specs=pl.BlockSpec((1, 1, 1), lambda p, k: (p, 0, 0)),
        scratch_shapes=[pltpu.VMEM((c, 128), jnp.float32)],
        compiler_params=pltpu.CompilerParams(
            dimension_semantics=("parallel", "arbitrary"),
            vmem_limit_bytes=vmem_limit_bytes,
        ),
    )(pred_t, target2d, w_on, w_off)

    # Each per-core partial already carries -1/N; just add them up.
    return jnp.sum(partials)


def get_loss_ref(pred, target, weight):
    """Pure-JAX reference matching the PyTorch semantics."""
    n, c = pred.shape
    one_hot = jax.nn.one_hot(target, c, dtype=jnp.float32)
    one_hot = one_hot * (1.0 - EPS) + (1.0 - one_hot) * (EPS / (c - 1))
    log_prb = jax.nn.log_softmax(pred.astype(jnp.float32), axis=1)
    w = weight.astype(jnp.float32)[None, :]
    return -jnp.mean(jnp.sum(one_hot * log_prb * w, axis=1))


if __name__ == "__main__":
    key = jax.random.PRNGKey(0)
    k1, k2, k3 = jax.random.split(key, 3)

    C = 8  # DALES has 8 semantic classes
    weight = jax.random.uniform(k3, (C,), dtype=jnp.float32, minval=0.5, maxval=1.5)

    # Case 1: tiny N -> single, ragged (unpadded) tile.
    N = 16
    pred = jax.random.normal(k1, (N, C), dtype=jnp.float32)
    target = jax.random.randint(k2, (N,), 0, C, dtype=jnp.int32)
    loss = jax.block_until_ready(get_loss_pallas(pred, target, weight))
    ref = jax.block_until_ready(get_loss_ref(pred, target, weight))
    assert jnp.allclose(loss, ref, atol=2e-5, rtol=2e-5), (loss, ref)

    # Case 2: multi-tile grid + unpadded ragged last tile (N % tile != 0).
    N2 = 300
    pred2 = jax.random.normal(k1, (N2, C), dtype=jnp.float32)
    target2 = jax.random.randint(k2, (N2,), 0, C, dtype=jnp.int32)
    loss2 = jax.block_until_ready(
        get_loss_pallas(pred2, target2, weight, tile_n_max=128, n_cores=1))
    ref2 = jax.block_until_ready(get_loss_ref(pred2, target2, weight))
    assert jnp.allclose(loss2, ref2, atol=2e-5, rtol=2e-5), (loss2, ref2)

    # Case 3: explicit 2-core grid (v7x-style) incl. an over-covering tile.
    loss3 = jax.block_until_ready(
        get_loss_pallas(pred2, target2, weight, tile_n_max=128, n_cores=2))
    assert jnp.allclose(loss3, ref2, atol=2e-5, rtol=2e-5), (loss3, ref2)

    # Case 4: bf16 logits, tile exactly divides N (no-mask fast path).
    N4 = 1024
    pred4 = jax.random.normal(k1, (N4, C), dtype=jnp.float32).astype(jnp.bfloat16)
    target4 = jax.random.randint(k2, (N4,), 0, C, dtype=jnp.int32)
    loss4 = jax.block_until_ready(get_loss_pallas(pred4, target4, weight))
    ref4 = jax.block_until_ready(get_loss_ref(pred4, target4, weight))
    assert jnp.allclose(loss4, ref4, atol=2e-5, rtol=2e-5), (loss4, ref4)

    print("KERNEL_OK")
</pallas_src>

<mosaic_0001>
module attributes {stable_mosaic.version = 11 : i64} {
  func.func @_loss_kernel(%arg0: i32, %arg1: i32, %arg2: memref<8x128xf32, #tpu.memory_space<vmem>>, %arg3: memref<1x128xi32, #tpu.memory_space<vmem>>, %arg4: memref<8x1xf32, #tpu.memory_space<vmem>>, %arg5: memref<8x1xf32, #tpu.memory_space<vmem>>, %arg6: memref<1x1x1xf32, #tpu.memory_space<vmem>>, %arg7: memref<8x128xf32, #tpu.memory_space<vmem>>) attributes {dimension_semantics = [#tpu.dimension_semantics<parallel>, #tpu.dimension_semantics<arbitrary>], iteration_bounds = array<i64: 1, 1>, scalar_prefetch = 0 : i64, scratch_operands = 1 : i64, tpu.core_type = #tpu.core_type<tc>, window_params = [{transform_indices = @transform_0, window_bounds = array<i64: 8, 128>}, {transform_indices = @transform_1, window_bounds = array<i64: 1, 128>}, {pipeline_mode = #tpu.pipeline_mode<synchronous>, transform_indices = @transform_2, window_bounds = array<i64: 8, 1>}, {pipeline_mode = #tpu.pipeline_mode<synchronous>, transform_indices = @transform_3, window_bounds = array<i64: 8, 1>}, {transform_indices = @transform_4, window_bounds = array<i64: 1, 1, 1>}]} {
    %c0_i32 = arith.constant 0 : i32
    %0 = arith.cmpi eq, %arg1, %c0_i32 : i32
    %1 = arith.extui %0 : i1 to i32
    %c0_i32_0 = arith.constant 0 : i32
    %2 = arith.cmpi ne, %1, %c0_i32_0 : i32
    scf.if %2 {
      %cst_15 = arith.constant 0.000000e+00 : f32
      %38 = vector.broadcast %cst_15 : f32 to vector<8x128xf32>
      %c0_16 = arith.constant 0 : index
      %c0_17 = arith.constant 0 : index
      %39 = vector.load %arg7[%c0_16, %c0_17] : memref<8x128xf32, #tpu.memory_space<vmem>>, vector<8x128xf32>
      tpu.vector_store %arg7[%c0_16, %c0_17], %38 {strides = array<i32>} : memref<8x128xf32, #tpu.memory_space<vmem>>, vector<8x128xf32>,
    } else {
    }
    %c0 = arith.constant 0 : index
    %c0_1 = arith.constant 0 : index
    %3 = vector.load %arg2[%c0, %c0_1] : memref<8x128xf32, #tpu.memory_space<vmem>>, vector<8x128xf32>
    %c0_2 = arith.constant 0 : index
    %c0_3 = arith.constant 0 : index
    %4 = vector.load %arg3[%c0_2, %c0_3] : memref<1x128xi32, #tpu.memory_space<vmem>>, vector<1x128xi32>
    %c0_4 = arith.constant 0 : index
    %c0_5 = arith.constant 0 : index
    %5 = vector.load %arg4[%c0_4, %c0_5] : memref<8x1xf32, #tpu.memory_space<vmem>>, vector<8x1xf32>
    %c0_6 = arith.constant 0 : index
    %c0_7 = arith.constant 0 : index
    %6 = vector.load %arg5[%c0_6, %c0_7] : memref<8x1xf32, #tpu.memory_space<vmem>>, vector<8x1xf32>
    %7 = tpu.iota {dimensions = array<i32: 0>} : vector<8x1xi32>
    %8 = vector.broadcast %7 : vector<8x1xi32> to vector<8x128xi32>
    %9 = vector.broadcast %4 : vector<1x128xi32> to vector<8x128xi32>
    %10 = arith.cmpi eq, %8, %9 : vector<8x128xi32>
    %11 = vector.shape_cast %5 : vector<8x1xf32> to vector<8x1xf32>
    %12 = vector.broadcast %11 : vector<8x1xf32> to vector<8x128xf32>
    %13 = vector.shape_cast %6 : vector<8x1xf32> to vector<8x1xf32>
    %14 = vector.broadcast %13 : vector<8x1xf32> to vector<8x128xf32>
    %15 = arith.select %10, %12, %14 : vector<8x128xi1>, vector<8x128xf32>
    %cst = arith.constant dense<0xFF800000> : vector<128xf32>
    %16 = vector.multi_reduction <maximumf>, %3, %cst [0] : vector<8x128xf32> to vector<128xf32>
    %17 = vector.shape_cast %16 : vector<128xf32> to vector<1x128xf32>
    %18 = vector.broadcast %17 : vector<1x128xf32> to vector<8x128xf32>
    %19 = arith.subf %3, %18 : vector<8x128xf32>
    %20 = math.exp %19 : vector<8x128xf32>
    %cst_8 = arith.constant dense<0.000000e+00> : vector<128xf32>
    %21 = vector.multi_reduction <add>, %20, %cst_8 [0] : vector<8x128xf32> to vector<128xf32>
    %22 = vector.shape_cast %21 : vector<128xf32> to vector<1x128xf32>
    %23 = math.log %22 : vector<1x128xf32>
    %24 = vector.broadcast %23 : vector<1x128xf32> to vector<8x128xf32>
    %25 = arith.subf %19, %24 : vector<8x128xf32>
    %26 = arith.mulf %15, %25 : vector<8x128xf32>
    %c1_i32 = arith.constant 1 : i32
    %27 = arith.muli %arg0, %c1_i32 : i32
    %28 = arith.addi %27, %arg1 : i32
    %c0_i32_9 = arith.constant 0 : i32
    %29 = arith.cmpi slt, %28, %c0_i32_9 : i32
    %30 = arith.extui %29 : i1 to i32
    %c0_i32_10 = arith.constant 0 : i32
    %31 = arith.cmpi ne, %30, %c0_i32_10 : i32
    scf.if %31 {
      %c0_15 = arith.constant 0 : index
      %c0_16 = arith.constant 0 : index
      %38 = vector.load %arg7[%c0_15, %c0_16] : memref<8x128xf32, #tpu.memory_space<vmem>>, vector<8x128xf32>
      %39 = arith.addf %38, %26 : vector<8x128xf32>
      %c0_17 = arith.constant 0 : index
      %c0_18 = arith.constant 0 : index
      %40 = vector.load %arg7[%c0_17, %c0_18] : memref<8x128xf32, #tpu.memory_space<vmem>>, vector<8x128xf32>
      tpu.vector_store %arg7[%c0_17, %c0_18], %39 {strides = array<i32>} : memref<8x128xf32, #tpu.memory_space<vmem>>, vector<8x128xf32>,
    } else {
    }
    %c0_i32_11 = arith.constant 0 : i32
    %32 = arith.cmpi eq, %28, %c0_i32_11 : i32
    %33 = arith.extui %32 : i1 to i32
    %c0_i32_12 = arith.constant 0 : i32
    %34 = arith.cmpi ne, %33, %c0_i32_12 : i32
    scf.if %34 {
      %38 = tpu.iota {dimensions = array<i32: 1>} : vector<1x128xi32>
      %c128_i32 = arith.constant 128 : i32
      %39 = arith.muli %28, %c128_i32 : i32
      %40 = vector.broadcast %39 : i32 to vector<1x128xi32>
      %41 = arith.addi %38, %40 : vector<1x128xi32>
      %c16_i32 = arith.constant 16 : i32
      %42 = vector.broadcast %c16_i32 : i32 to vector<1x128xi32>
      %43 = arith.cmpi slt, %41, %42 : vector<1x128xi32>
      %cst_15 = arith.constant 0.000000e+00 : f32
      %44 = vector.shape_cast %43 : vector<1x128xi1> to vector<1x128xi1>
      %45 = vector.broadcast %44 : vector<1x128xi1> to vector<8x128xi1>
      %46 = vector.broadcast %cst_15 : f32 to vector<8x128xf32>
      %47 = arith.select %45, %26, %46 : vector<8x128xi1>, vector<8x128xf32>
      %c0_16 = arith.constant 0 : index
      %c0_17 = arith.constant 0 : index
      %48 = vector.load %arg7[%c0_16, %c0_17] : memref<8x128xf32, #tpu.memory_space<vmem>>, vector<8x128xf32>
      %49 = arith.addf %48, %47 : vector<8x128xf32>
      %c0_18 = arith.constant 0 : index
      %c0_19 = arith.constant 0 : index
      %50 = vector.load %arg7[%c0_18, %c0_19] : memref<8x128xf32, #tpu.memory_space<vmem>>, vector<8x128xf32>
      tpu.vector_store %arg7[%c0_18, %c0_19], %49 {strides = array<i32>} : memref<8x128xf32, #tpu.memory_space<vmem>>, vector<8x128xf32>,
    } else {
    }
    %c0_i32_13 = arith.constant 0 : i32
    %35 = arith.cmpi eq, %arg1, %c0_i32_13 : i32
    %36 = arith.extui %35 : i1 to i32
    %c0_i32_14 = arith.constant 0 : i32
    %37 = arith.cmpi ne, %36, %c0_i32_14 : i32
    scf.if %37 {
      %c0_15 = arith.constant 0 : index
      %c0_16 = arith.constant 0 : index
      %38 = vector.load %arg7[%c0_15, %c0_16] : memref<8x128xf32, #tpu.memory_space<vmem>>, vector<8x128xf32>
      %39 = vector.shape_cast %38 : vector<8x128xf32> to vector<1x8x128xf32>
      %cst_17 = arith.constant dense<0.000000e+00> : vector<1xf32>
      %40 = vector.multi_reduction <add>, %39, %cst_17 [1, 2] : vector<1x8x128xf32> to vector<1xf32>
      %41 = vector.shape_cast %40 : vector<1xf32> to vector<1x1x1xf32>
      %42 = vector.extract %41[0, 0, 0] : f32 from vector<1x1x1xf32>
      %cst_18 = arith.constant -6.250000e-02 : f32
      %43 = arith.mulf %42, %cst_18 : f32
      %44 = vector.broadcast %43 : f32 to vector<1x1x1xf32>
      %c0_19 = arith.constant 0 : index
      %c0_20 = arith.constant 0 : index
      %c0_21 = arith.constant 0 : index
      %45 = vector.load %arg6[%c0_19, %c0_20, %c0_21] : memref<1x1x1xf32, #tpu.memory_space<vmem>>, vector<1x1x1xf32>
      tpu.vector_store %arg6[%c0_19, %c0_20, %c0_21], %44 {strides = array<i32>} : memref<1x1x1xf32, #tpu.memory_space<vmem>>, vector<1x1x1xf32>,
    } else {
    }
    return
  }
  func.func @transform_0(%arg0: i32, %arg1: i32) -> (i32, i32) {
    %c1_i32 = arith.constant 1 : i32
    %0 = arith.muli %arg0, %c1_i32 : i32
    %1 = arith.addi %0, %arg1 : i32
    %c0_i32 = arith.constant 0 : i32
    %2 = arith.minsi %1, %c0_i32 : i32
    %c0_i32_0 = arith.constant 0 : i32
    %c0_i32_1 = arith.constant 0 : i32
    return %c0_i32_0, %2 : i32, i32
  }
  func.func @transform_1(%arg0: i32, %arg1: i32) -> (i32, i32) {
    %c1_i32 = arith.constant 1 : i32
    %0 = arith.muli %arg0, %c1_i32 : i32
    %1 = arith.addi %0, %arg1 : i32
    %c0_i32 = arith.constant 0 : i32
    %2 = arith.minsi %1, %c0_i32 : i32
    %c0_i32_0 = arith.constant 0 : i32
    %c0_i32_1 = arith.constant 0 : i32
    return %c0_i32_0, %2 : i32, i32
  }
  func.func @transform_2(%arg0: i32, %arg1: i32) -> (i32, i32) {
    %c0_i32 = arith.constant 0 : i32
    %c0_i32_0 = arith.constant 0 : i32
    %c0_i32_1 = arith.constant 0 : i32
    return %c0_i32, %c0_i32_0 : i32, i32
  }
  func.func @transform_3(%arg0: i32, %arg1: i32) -> (i32, i32) {
    %c0_i32 = arith.constant 0 : i32
    %c0_i32_0 = arith.constant 0 : i32
    %c0_i32_1 = arith.constant 0 : i32
    return %c0_i32, %c0_i32_0 : i32, i32
  }
  func.func @transform_4(%arg0: i32, %arg1: i32) -> (i32, i32, i32) {
    %c0_i32 = arith.constant 0 : i32
    %c0_i32_0 = arith.constant 0 : i32
    %c0_i32_1 = arith.constant 0 : i32
    return %arg0, %c0_i32, %c0_i32_0 : i32, i32, i32
  }
}

</mosaic_0001>

<bundles_post_ra>
// kernel: tpu_custom_call.1
= control target key start
LH: loop header
LB: loop body
LE: loop exit
PB: predicated region body
PF: predicated region fallthrough
CT: control target
= control target key end

     0   :  { %v214_v1 = vmov 0   ;;  %s256_s0 = inlined_call_operand.vmem [shape: f32[8,16], index: 0, kind: input, shape index: {}]   ;;  %s257_s1 = inlined_call_operand.vmem [shape: s32[1,16], index: 1, kind: input, shape index: {}]   ;;  %s258_s2 = inlined_call_operand.vmem [shape: f32[8,1], index: 2, kind: input, shape index: {}]   ;;  %s259_s3 = inlined_call_operand.vmem [shape: f32[8,1], index: 3, kind: input, shape index: {}]   ;;  %s260_s4 = inlined_call_operand.hbm [shape: f32[1,1,1], index: 4, kind: output, shape index: {}]  }
   0x1   :  { %v76_v0 = vld [vmem:[%s258_s2] sm:$0xff]  ;;  %182 = vset.pattern.permute.xlu0 %v214_v1 }
   0x2   :  { %9 = vsyncpa [#allocation4], 0  ;;  %84 = vperm.xlu0 %182, %v76_v0   ;;  %v77_v2 = vld [vmem:[%s259_s3] sm:$0xff]  ;;  %v78_v19 = vlaneseq  ;;  %s215_s3 = smov [#allocation3]   ;;  %s160_s23 = sshll.u32 %s260_s4, 4  ;;  %vm151_vm2 = vcmask 0   ;;  %s161_s23 = int_to_ptr.hbm [resolvable:$true] %s160_s23 }
   0x3   :  { %v74_v3 = vld [vmem:[%s256_s0] sm:$0xff] }
   0x4   :  { %v93_v4 = vrot.slane %v74_v3, 4  ;;  %v79_v22 = vshrl.u32 %v78_v19, 7  ;;  %v183_v23 = vld [vmem:[%s257_s1] ss:$0 sm:$0xff]  ;;  %v125_v25 = vand.u32 127, %v78_v19  ;;  %s158_s1 = sshll.u32 %s215_s3, 4  ;;  %s159_s1 = int_to_ptr.vmem [resolvable:$true] %s158_s1 }
   0x6   :  { %v94_v5 = vmax.f32 %v74_v3, %v93_v4  ;;  %vm81_vm0 = vcmp.eq.s32.totalorder %v79_v22, %v183_v23  ;;  %vm129_vm1 = vcmp.lt.s32.totalorder %v125_v25, 16 }
   0x8   :  { %v95_v6 = vrot.slane %v94_v5, 2 }
   0xa   :  { %89 = vperm.xlu0 %182, %v77_v2   ;;  %v96_v7 = vmax.f32 %v94_v5, %v95_v6 }
   0xc   :  { %v97_v8 = vrot.slane %v96_v7, 1 }
   0xe   :  { %v98_v9 = vmax.f32 %v96_v7, %v97_v8 }
  0x10   :  { %v99_v10 = vsub.f32 %v74_v3, %v98_v9 }
  0x12   :  { %v100_v11 = vmul.f32 1.442695, %v99_v10 }
  0x14   :  { %184 = vpow2.f32 %v100_v11 }
  0x1a   :  { %v185_v12 = vpop.eup %184 }
  0x1b   :  { %v102_v13 = vrot.slane %v185_v12, 4 }
  0x1d   :  { %v103_v14 = vadd.f32 %v185_v12, %v102_v13 }
  0x1f   :  { %v104_v15 = vrot.slane %v103_v14, 2 }
  0x21   :  { %v105_v16 = vadd.f32 %v104_v15, %v103_v14 }
  0x23   :  { %v106_v17 = vrot.slane %v105_v16, 1 }
  0x25   :  { %v107_v18 = vadd.f32 %v106_v17, %v105_v16 }
  0x27   :  { %186 = vlog2.f32 %v107_v18 }
  0x2d   :  { %v187_v20 = vpop.eup %186 }
  0x2e   :  { %v109_v24 = vmul.f32 0.6931472, %v187_v20 }
  0x30   :  { %v110_v26 = vsub.f32 %v99_v10, %v109_v24 }
  0x74   :  { %v85_v21 = vpop.permute.xlu0 %84 }
  0x7c   :  { %v90_v27 = vpop.permute.xlu0 %89 }
  0x7d   :  { %v92_v28 = vsel %vm81_vm0, %v85_v21, %v90_v27 }
  0x7e   :  { %v111_v29 = vmul.f32 %v110_v26, %v92_v28 }
  0x80   :  { %v132_v30 = vsel %vm129_vm1, %v111_v29, 0.0 }
  0x81   :  { %140 = vadd.xlane.f32.xlu1 %v132_v30 }
  0xf4   :  { %v141_v31 = vpop.xlane.xlu1 %140 }
  0xf5   :  { %v142_v32 = vrot.slane %v141_v31, 4 }
  0xf7   :  { %v143_v33 = vadd.f32 %v142_v32, %v141_v31 }
  0xf9   :  { %v144_v34 = vrot.slane %v143_v33, 2 }
  0xfb   :  { %v145_v35 = vadd.f32 %v144_v34, %v143_v33 }
  0xfd   :  { %v146_v36 = vrot.slane %v145_v35, 1 }
  0xff   :  { %v147_v37 = vadd.f32 %v146_v36, %v145_v35 }
 0x101   :  { %178 = vpush %v147_v37 }
 0x132   :  { %s179_s24 = spop %178 }
 0x133   :  { %s149_s25 = smul.f32 -0.0625, %s179_s24 }
 0x135   :  { %v150_v38 = vstv %s149_s25 }
 0x136   :  { %152 = vst.msk [vmem:[#allocation3] sm:$0x1] %vm151_vm2, %v150_v38 }
 0x137   :  { %163 = dma.vmem_to_hbm [thread:$0]  %s159_s1, 16, %s161_s23, [#allocation4]  }
 0x138   :  { %212 = dma.done.wait [#allocation4], 16  }
 0x139   :  { %213 = vsyncadd [#allocation4], 4294967280 }
 0x13a   :  { %168 = vsyncpa [#allocation4], 1 }

</bundles_post_ra>
